<compile_context>
chip_gen: v7x
topology: tpu7x:2x2x1
jax: 0.10.0
libtpu: 0.0.40
codegen_flags: <defaults>
</compile_context>

<pallas_src>
import numpy as np
import jax
import jax.numpy as jnp
from jax.experimental import pallas as pl
from jax.experimental.pallas import tpu as pltpu

_LANE = 128
_TARGET_BLOCK_BYTES = 4 * 1024 * 1024     # per-block VMEM budget (x2 buffers)
_MAX_ROWS_PER_BLOCK = 32768
_SMALL_FAST_PATH = 256 * 1024             # elems; below this plain XLA wins
_VMEM_LIMIT_BYTES = 32 * 1024 * 1024      # safe on v5e/v6e/v7x

# Dtypes we store from the kernel without probing.
_KNOWN_GOOD_STORE = frozenset(
    np.dtype(d) for d in (np.int8, np.uint8, np.int32, np.uint32,
                          np.float32, jnp.bfloat16)
)
_STORE_PROBE_CACHE = {}


def _round_up(x, m):
    return ((x + m - 1) // m) * m


def _round_down(x, m):
    return (x // m) * m


def _sublane_pack(dtype):
    # Rows packed per vreg sublane group: int8/bool -> 32, bf16 -> 16, f32 -> 8.
    return max(8, 32 // np.dtype(dtype).itemsize)


def _seq_mask_kernel(row_ref, o_ref):
    """Replicate the (1, tc) constant row (already final dtype) down the rows."""
    o_ref[...] = jnp.broadcast_to(row_ref[...], o_ref.shape)


def _mask_2d_pallas(n, maxlen, store_dtype,
                    target_block_bytes=_TARGET_BLOCK_BYTES):
    """(n, maxlen) mask in `store_dtype`: column 0 is 1, rest 0, written once."""
    elem = np.dtype(store_dtype).itemsize
    sub = _sublane_pack(store_dtype)
    m_lanes = _round_up(maxlen, _LANE)        # VMEM lane footprint of a row

    if sub * m_lanes * elem <= target_block_bytes:
        # Common case: one column block spanning the full maxlen (full-dim last
        # block dim is legal even when maxlen % 128 != 0).
        tc = maxlen
        tn = _round_down(
            min(target_block_bytes // (m_lanes * elem), _MAX_ROWS_PER_BLOCK), sub)
        tn = max(sub, tn)
    else:
        # Huge maxlen: tile columns too so a block stays inside the VMEM budget.
        tn = sub
        tc = _round_down(target_block_bytes // (sub * elem), _LANE)
        tc = max(_LANE, tc)
        if tc > maxlen:
            tc = maxlen
    if tn > n:
        tn = n                                 # full-dim row block (always legal)

    grid = (pl.cdiv(n, tn), pl.cdiv(maxlen, tc))

    # Constant row in the *final* dtype: [1, 0, 0, ...].  torch.ones(...) makes
    # the compare value a constant 1, so the whole row is a compile-time
    # constant; the kernel only replicates + stores it.
    row = (jnp.arange(maxlen, dtype=jnp.int32) < 1).astype(store_dtype)
    row = row.reshape(1, maxlen)

    return pl.pallas_call(
        _seq_mask_kernel,
        out_shape=jax.ShapeDtypeStruct((n, maxlen), store_dtype),
        grid=grid,
        in_specs=[pl.BlockSpec((1, tc), lambda i, j: (0, j))],
        out_specs=pl.BlockSpec((tn, tc), lambda i, j: (i, j)),
        compiler_params=pltpu.CompilerParams(
            dimension_semantics=("parallel", "parallel"),
            vmem_limit_bytes=_VMEM_LIMIT_BYTES,
        ),
    )(row)


def _store_dtype_for(dtype):
    """Dtype the kernel stores directly; probe Mosaic once for e.g. bool."""
    d = np.dtype(dtype)
    if d in _KNOWN_GOOD_STORE:
        return d
    if d not in _STORE_PROBE_CACHE:
        try:
            got = np.asarray(jax.block_until_ready(_mask_2d_pallas(64, 256, d)))
            want = np.zeros((64, 256), dtype=d)
            want[:, 0] = 1
            _STORE_PROBE_CACHE[d] = bool(np.array_equal(got, want))
        except Exception:
            _STORE_PROBE_CACHE[d] = False
    return d if _STORE_PROBE_CACHE[d] else np.dtype(np.int8)


def sequence_mask(lengths, maxlen=None, dtype=jnp.bool_):
    """JAX/Pallas equivalent of SequenceMask.forward(lengths, maxlen)."""
    # `lengths` is a shape spec (int or tuple), exactly like torch.ones(lengths).
    if isinstance(lengths, (int, np.integer)):
        shape = (int(lengths),)
    else:
        shape = tuple(int(s) for s in lengths)

    if maxlen is None:
        maxlen = 1            # torch.ones(lengths, dtype).max() is always 1/True
    maxlen = int(maxlen)

    out_dtype = np.dtype(dtype)
    n = int(np.prod(shape)) if shape else 1

    # Fast path: small outputs / degenerate maxlen -> XLA's fused fill already
    # hits store roofline and skips the pallas launch/prologue cost.
    if maxlen <= 1 or n == 0 or n * maxlen <= _SMALL_FAST_PATH:
        mask = jnp.broadcast_to(jnp.arange(max(maxlen, 0), dtype=jnp.int32) < 1,
                                shape + (max(maxlen, 0),))
        return mask.astype(out_dtype)

    store_dtype = _store_dtype_for(out_dtype)
    flat = _mask_2d_pallas(n, maxlen, store_dtype)
    mask = flat.reshape(shape + (maxlen,))      # metadata-only reshape
    if store_dtype != out_dtype:
        mask = mask.astype(out_dtype)           # only if direct store unsupported
    return mask


if __name__ == "__main__":
    # Inputs are structural (a shape + an int); key kept for determinism hygiene.
    _ = jax.random.PRNGKey(0)

    # 1) Kernel path: lengths-shape (16, 256) -> N = 4096 rows; maxlen = 200
    #    exercises the unpadded, non-multiple-of-128 full-width last block dim.
    lengths = (16, 256)
    maxlen = 200
    out = jax.block_until_ready(sequence_mask(lengths, maxlen=maxlen))
    assert out.shape == (16, 256, maxlen), out.shape
    assert out.dtype == jnp.bool_, out.dtype
    ref = np.zeros((16, 256, maxlen), dtype=bool)
    ref[..., 0] = True                           # mask[..., j] = (j < 1)
    assert np.array_equal(np.asarray(out), ref)

    # 2) Column-tiled path (forced small block budget so it runs at test size).
    flat = jax.block_until_ready(
        _mask_2d_pallas(64, 1024, np.dtype(np.int8), target_block_bytes=16 * 1024))
    ref2 = np.zeros((64, 1024), dtype=np.int8)
    ref2[:, 0] = 1
    assert flat.shape == (64, 1024)
    assert np.array_equal(np.asarray(flat), ref2)

    # 3) Small-shape fast path (the original module's tiny use case).
    out_small = jax.block_until_ready(sequence_mask(8, maxlen=16))
    ref_small = np.arange(16)[None, :] < np.ones((8, 1), dtype=np.int32)
    assert out_small.shape == (8, 16) and out_small.dtype == jnp.bool_
    assert np.array_equal(np.asarray(out_small), ref_small)

    # 4) maxlen=None branch: maxlen == ones.max() == 1, all True.
    out_none = jax.block_until_ready(sequence_mask(8, maxlen=None))
    assert out_none.shape == (8, 1) and bool(np.all(np.asarray(out_none)))

    print("KERNEL_OK")
</pallas_src>

<mosaic_0001>
module attributes {stable_mosaic.version = 11 : i64} {
  func.func @_seq_mask_kernel(%arg0: i32, %arg1: i32, %arg2: memref<1x256xi32, #tpu.memory_space<vmem>>, %arg3: memref<64x256xi32, #tpu.memory_space<vmem>>) attributes {dimension_semantics = [#tpu.dimension_semantics<parallel>, #tpu.dimension_semantics<parallel>], iteration_bounds = array<i64: 1, 1>, scalar_prefetch = 0 : i64, scratch_operands = 0 : i64, tpu.core_type = #tpu.core_type<tc>, window_params = [{transform_indices = @transform_0, window_bounds = array<i64: 1, 256>}, {transform_indices = @transform_1, window_bounds = array<i64: 64, 256>}]} {
    %c0 = arith.constant 0 : index
    %c0_0 = arith.constant 0 : index
    %0 = vector.load %arg2[%c0, %c0_0] : memref<1x256xi32, #tpu.memory_space<vmem>>, vector<1x256xi32>
    %cst = arith.constant dense<0> : vector<1x256xi32>
    %1 = arith.cmpi ne, %0, %cst : vector<1x256xi32>
    %2 = vector.shape_cast %1 : vector<1x256xi1> to vector<1x256xi1>
    %3 = vector.broadcast %2 : vector<1x256xi1> to vector<64x256xi1>
    %c0_1 = arith.constant 0 : index
    %c0_2 = arith.constant 0 : index
    %4 = vector.load %arg3[%c0_1, %c0_2] : memref<64x256xi32, #tpu.memory_space<vmem>>, vector<64x256xi32>
    %5 = arith.extui %3 : vector<64x256xi1> to vector<64x256xi32>
    %cst_3 = arith.constant dense<0> : vector<64x256xi32>
    %6 = arith.cmpi ne, %4, %cst_3 : vector<64x256xi32>
    tpu.vector_store %arg3[%c0_1, %c0_2], %5 {strides = array<i32>} : memref<64x256xi32, #tpu.memory_space<vmem>>, vector<64x256xi32>,
    return
  }
  func.func @transform_0(%arg0: i32, %arg1: i32) -> (i32, i32) {
    %c0_i32 = arith.constant 0 : i32
    %c0_i32_0 = arith.constant 0 : i32
    return %c0_i32, %arg1 : i32, i32
  }
  func.func @transform_1(%arg0: i32, %arg1: i32) -> (i32, i32) {
    %c0_i32 = arith.constant 0 : i32
    return %arg0, %arg1 : i32, i32
  }
}

module attributes {stable_mosaic.version = 11 : i64} {
  func.func @_seq_mask_kernel(%arg0: i32, %arg1: i32, %arg2: memref<1x200xi8, #tpu.memory_space<vmem>>, %arg3: memref<4096x200xi8, #tpu.memory_space<vmem>>) attributes {dimension_semantics = [#tpu.dimension_semantics<parallel>, #tpu.dimension_semantics<parallel>], iteration_bounds = array<i64: 1, 1>, scalar_prefetch = 0 : i64, scratch_operands = 0 : i64, tpu.core_type = #tpu.core_type<tc>, window_params = [{transform_indices = @transform_0, window_bounds = array<i64: 1, 200>}, {transform_indices = @transform_1, window_bounds = array<i64: 4096, 200>}]} {
    %c0 = arith.constant 0 : index
    %c0_0 = arith.constant 0 : index
    %0 = vector.load %arg2[%c0, %c0_0] : memref<1x200xi8, #tpu.memory_space<vmem>>, vector<1x200xi8>
    %1 = vector.shape_cast %0 : vector<1x200xi8> to vector<1x200xi8>
    %2 = vector.broadcast %1 : vector<1x200xi8> to vector<4096x200xi8>
    %c0_1 = arith.constant 0 : index
    %c0_2 = arith.constant 0 : index
    %3 = vector.load %arg3[%c0_1, %c0_2] : memref<4096x200xi8, #tpu.memory_space<vmem>>, vector<4096x200xi8>
    tpu.vector_store %arg3[%c0_1, %c0_2], %2 {strides = array<i32>} : memref<4096x200xi8, #tpu.memory_space<vmem>>, vector<4096x200xi8>,
    return
  }
  func.func @transform_0(%arg0: i32, %arg1: i32) -> (i32, i32) {
    %c0_i32 = arith.constant 0 : i32
    %c0_i32_0 = arith.constant 0 : i32
    return %c0_i32, %arg1 : i32, i32
  }
  func.func @transform_1(%arg0: i32, %arg1: i32) -> (i32, i32) {
    %c0_i32 = arith.constant 0 : i32
    return %arg0, %arg1 : i32, i32
  }
}

</mosaic_0001>

<bundles_post_ra>
// kernel: tpu_custom_call.1
= control target key start
LH: loop header
LB: loop body
LE: loop exit
PB: predicated region body
PF: predicated region fallthrough
CT: control target
= control target key end

     0   :  { %v11_v0 = vlaneseq  ;;  %v44_v3 = vmov 0   ;;  %s106_s0 = inlined_call_operand.vmem [shape: s32[1,256], index: 0, kind: input, shape index: {}]   ;;  %s107_s1 = inlined_call_operand.vmem [shape: s32[64,256], index: 1, kind: output, shape index: {}]  }
   0x1   :  { %v8_v1 = vld [vmem:[%s106_s0] sm:$0x3] }
   0x2   :  { %vm9_vm0 = vcmp.ne.s32.totalorder %v8_v1, 0  ;;  %v12_v2 = vshrl.u32 %v11_v0, 7 }
   0x3   :  { %v10_v4 = vsel %vm9_vm0, 1, %v44_v3 }
   0x4   :  { %v13_v5 = vsub.s32 0, %v12_v2  ;;  %v17_v6 = vsub.s32 1, %v12_v2 }
   0x6   :  { %v14_v7 = vrot.slane %v10_v4, %v13_v5  ;;  %v18_v8 = vrot.slane %v10_v4, %v17_v6 }
   0x8   :  { %vm19_vm1 = vcmp.eq.s32.totalorder %v14_v7, 1  ;;  %vm20_vm2 = vcmp.eq.s32.totalorder %v18_v8, 1 }
   0x9   :  { %v21_v9 = vsel %vm19_vm1, 1, %v44_v3  ;;  %v22_v10 = vsel %vm20_vm2, 1, %v44_v3 }
   0xa   :  { %23 = vst [vmem:[%s107_s1] sm:$0xff] %v21_v9  ;;  %25 = vst [vmem:[%s107_s1 + $0x10] sm:$0xff] %v21_v9 }
   0xb   :  { %27 = vst [vmem:[%s107_s1 + $0x20] sm:$0xff] %v21_v9  ;;  %29 = vst [vmem:[%s107_s1 + $0x30] sm:$0xff] %v21_v9 }
   0xc   :  { %31 = vst [vmem:[%s107_s1 + $0x40] sm:$0xff] %v21_v9  ;;  %33 = vst [vmem:[%s107_s1 + $0x50] sm:$0xff] %v21_v9 }
   0xd   :  { %35 = vst [vmem:[%s107_s1 + $0x60] sm:$0xff] %v21_v9  ;;  %37 = vst [vmem:[%s107_s1 + $0x70] sm:$0xff] %v21_v9 }
   0xe   :  { %24 = vst [vmem:[%s107_s1 + $0x8] sm:$0xff] %v22_v10  ;;  %26 = vst [vmem:[%s107_s1 + $0x18] sm:$0xff] %v22_v10 }
   0xf   :  { %28 = vst [vmem:[%s107_s1 + $0x28] sm:$0xff] %v22_v10  ;;  %30 = vst [vmem:[%s107_s1 + $0x38] sm:$0xff] %v22_v10 }
  0x10   :  { %32 = vst [vmem:[%s107_s1 + $0x48] sm:$0xff] %v22_v10  ;;  %34 = vst [vmem:[%s107_s1 + $0x58] sm:$0xff] %v22_v10 }
  0x11   :  { %36 = vst [vmem:[%s107_s1 + $0x68] sm:$0xff] %v22_v10  ;;  %38 = vst [vmem:[%s107_s1 + $0x78] sm:$0xff] %v22_v10 }

// kernel: tpu_custom_call.1
= control target key start
LH: loop header
LB: loop body
LE: loop exit
PB: predicated region body
PF: predicated region fallthrough
CT: control target
= control target key end

     0   :  { %6 = vsyncpa [#allocation3], 0  ;;  %s608_s6 = smov [#allocation2]   ;;  %s3710_s0 = inlined_call_operand.hbm [shape: s8[1,200], index: 0, kind: input, shape index: {}]   ;;  %s3711_s1 = inlined_call_operand.vmem [shape: s8[4096,200], index: 1, kind: output, shape index: {}]  }
   0x1   :  { %s13_s7 = sshll.u32 %s608_s6, 4  ;;  %s584_s10 = scalar_lea.hbm %s3710_s0, 32  ;;  %s14_s7 = int_to_ptr.vmem [resolvable:$true] %s13_s7 }
   0x2   :  { %p585_p0 = scmp.ne.s32.totalorder %s3710_s0, %s584_s10  ;;  %p588_p1 = scmp.lt.u32.totalorder %s584_s10, %s3710_s0 }
   0x4   :  { %p590_p2 = pnand %p588_p1, %p585_p0 }
   0x6   :  { %593 = shalt.err (!%p590_p2)
}
   0x7   :  { %s594_s15 = scalar_lea.vmem %s14_s7, 32  ;;  %p599_p4 = scmp.lt.s32.totalorder %s14_s7, %s14_s7 }
   0x8   :  { %p595_p3 = scmp.ne.s32.totalorder %s14_s7, %s594_s15  ;;  %p600_p5 = scmp.lt.s32.totalorder %s594_s15, %s594_s15 }
   0xa   :  { %p601_p6 = por %p600_p5, %p599_p4 }
   0xc   :  { %p602_p7 = pnand %p601_p6, %p595_p3 }
   0xe   :  { %605 = shalt.err (!%p602_p7)
}
   0xf   :  { %16 = dma.hbm_to_vmem [thread:$0]  %s3710_s0, 32, %s14_s7, [#allocation3]  }
  0x10   :  { %606 = dma.done.wait [#allocation3], 32  }
  0x11   :  { %607 = vsyncadd [#allocation3], 4294967264  ;;  %v32_v0 = vlaneseq  ;;  %v609_v1 = vmov 1966171168   ;;  %vm61_vm0 = vcmask 1041408   ;;  %vm62_vm1 = vcmask 584706  }
  0x12   :  { %v30_v2 = vunpack.c.l.s4 %v609_v1  ;;  %v581_v6 = vld.sshfl [vmem:[#allocation2] sm:$0x11 pattern:$0x75316420]  ;;  %vm632_vm2 = vmor %vm62_vm1, %vm61_vm0 }
  0x13   :  { %v33_v3 = vshrl.u32 %v32_v0, 7  ;;  %v28_v7 = vcombine.high %v581_v6, %v581_v6 }
  0x14   :  { %v31_v4 = vunpack.c.0.s8 %v30_v2 }
  0x15   :  { %v48_v11 = vsub.s32 0, %v33_v3 }
  0x16   :  { %v34_v5 = vsub.s32 %v31_v4, %v33_v3 }
  0x18   :  { %v35_v8 = vrot.slane %v581_v6, %v34_v5  ;;  %v42_v9 = vrot.slane %v28_v7, %v34_v5 }
  0x1a   :  { %v44_v10 = vpack.i.b16 %v35_v8, %v35_v8  ;;  %v51_v13 = vpack.i.b16 %v42_v9, %v42_v9 }
  0x1c   :  { %v45_v12 = vpack.i.b8 %v44_v10, %v44_v10  ;;  %v52_v15 = vpack.i.b8 %v51_v13, %v51_v13 }
  0x1e   :  { %v49_v14 = vrot.slane %v45_v12, %v48_v11  ;;  %v56_v16 = vrot.slane %v52_v15, %v48_v11 }
  0x20   :  { %v57_v17 = vunpack.c.0.s8 %v49_v14  ;;  %v58_v18 = vunpack.c.0.s8 %v56_v16 }
  0x22   :  { %v59_v19 = vpack.c.b16 %v58_v18, %v57_v17 }
  0x24   :  { %v636_v21 = vpack.c.b8 %v59_v19, %v59_v19 }
  0x26   :  { %64 = vst.msk [vmem:[%s3711_s1] sm:$0xf] %vm632_vm2, %v636_v21  ;;  %65 = vst.msk [vmem:[%s3711_s1 + $0x4] sm:$0xf] %vm632_vm2, %v636_v21 }
  0x27   :  { %66 = vst.msk [vmem:[%s3711_s1 + $0x8] sm:$0xf] %vm632_vm2, %v636_v21  ;;  %67 = vst.msk [vmem:[%s3711_s1 + $0xc] sm:$0xf] %vm632_vm2, %v636_v21 }
  0x28   :  { %68 = vst.msk [vmem:[%s3711_s1 + $0x10] sm:$0xf] %vm632_vm2, %v636_v21  ;;  %69 = vst.msk [vmem:[%s3711_s1 + $0x14] sm:$0xf] %vm632_vm2, %v636_v21 }
  0x29   :  { %70 = vst.msk [vmem:[%s3711_s1 + $0x18] sm:$0xf] %vm632_vm2, %v636_v21  ;;  %71 = vst.msk [vmem:[%s3711_s1 + $0x1c] sm:$0xf] %vm632_vm2, %v636_v21 }
  0x2a   :  { %72 = vst.msk [vmem:[%s3711_s1 + $0x20] sm:$0xf] %vm632_vm2, %v636_v21  ;;  %73 = vst.msk [vmem:[%s3711_s1 + $0x24] sm:$0xf] %vm632_vm2, %v636_v21 }
  0x2b   :  { %74 = vst.msk [vmem:[%s3711_s1 + $0x28] sm:$0xf] %vm632_vm2, %v636_v21  ;;  %75 = vst.msk [vmem:[%s3711_s1 + $0x2c] sm:$0xf] %vm632_vm2, %v636_v21 }
  0x2c   :  { %76 = vst.msk [vmem:[%s3711_s1 + $0x30] sm:$0xf] %vm632_vm2, %v636_v21  ;;  %77 = vst.msk [vmem:[%s3711_s1 + $0x34] sm:$0xf] %vm632_vm2, %v636_v21 }
  0x2d   :  { %78 = vst.msk [vmem:[%s3711_s1 + $0x38] sm:$0xf] %vm632_vm2, %v636_v21  ;;  %79 = vst.msk [vmem:[%s3711_s1 + $0x3c] sm:$0xf] %vm632_vm2, %v636_v21 }
  0x2e   :  { %80 = vst.msk [vmem:[%s3711_s1 + $0x40] sm:$0xf] %vm632_vm2, %v636_v21  ;;  %81 = vst.msk [vmem:[%s3711_s1 + $0x44] sm:$0xf] %vm632_vm2, %v636_v21 }
  0x2f   :  { %82 = vst.msk [vmem:[%s3711_s1 + $0x48] sm:$0xf] %vm632_vm2, %v636_v21  ;;  %83 = vst.msk [vmem:[%s3711_s1 + $0x4c] sm:$0xf] %vm632_vm2, %v636_v21 }
  0x30   :  { %84 = vst.msk [vmem:[%s3711_s1 + $0x50] sm:$0xf] %vm632_vm2, %v636_v21  ;;  %85 = vst.msk [vmem:[%s3711_s1 + $0x54] sm:$0xf] %vm632_vm2, %v636_v21 }
  0x31   :  { %86 = vst.msk [vmem:[%s3711_s1 + $0x58] sm:$0xf] %vm632_vm2, %v636_v21  ;;  %87 = vst.msk [vmem:[%s3711_s1 + $0x5c] sm:$0xf] %vm632_vm2, %v636_v21 }
  0x32   :  { %88 = vst.msk [vmem:[%s3711_s1 + $0x60] sm:$0xf] %vm632_vm2, %v636_v21  ;;  %89 = vst.msk [vmem:[%s3711_s1 + $0x64] sm:$0xf] %vm632_vm2, %v636_v21 }
  0x33   :  { %90 = vst.msk [vmem:[%s3711_s1 + $0x68] sm:$0xf] %vm632_vm2, %v636_v21  ;;  %91 = vst.msk [vmem:[%s3711_s1 + $0x6c] sm:$0xf] %vm632_vm2, %v636_v21 }
  0x34   :  { %92 = vst.msk [vmem:[%s3711_s1 + $0x70] sm:$0xf] %vm632_vm2, %v636_v21  ;;  %93 = vst.msk [vmem:[%s3711_s1 + $0x74] sm:$0xf] %vm632_vm2, %v636_v21 }
  0x35   :  { %94 = vst.msk [vmem:[%s3711_s1 + $0x78] sm:$0xf] %vm632_vm2, %v636_v21  ;;  %95 = vst.msk [vmem:[%s3711_s1 + $0x7c] sm:$0xf] %vm632_vm2, %v636_v21 }
  0x36   :  { %96 = vst.msk [vmem:[%s3711_s1 + $0x80] sm:$0xf] %vm632_vm2, %v636_v21  ;;  %97 = vst.msk [vmem:[%s3711_s1 + $0x84] sm:$0xf] %vm632_vm2, %v636_v21 }
  0x37   :  { %98 = vst.msk [vmem:[%s3711_s1 + $0x88] sm:$0xf] %vm632_vm2, %v636_v21  ;;  %99 = vst.msk [vmem:[%s3711_s1 + $0x8c] sm:$0xf] %vm632_vm2, %v636_v21 }
  0x38   :  { %100 = vst.msk [vmem:[%s3711_s1 + $0x90] sm:$0xf] %vm632_vm2, %v636_v21  ;;  %101 = vst.msk [vmem:[%s3711_s1 + $0x94] sm:$0xf] %vm632_vm2, %v636_v21 }
  0x39   :  { %102 = vst.msk [vmem:[%s3711_s1 + $0x98] sm:$0xf] %vm632_vm2, %v636_v21  ;;  %103 = vst.msk [vmem:[%s3711_s1 + $0x9c] sm:$0xf] %vm632_vm2, %v636_v21 }
  0x3a   :  { %104 = vst.msk [vmem:[%s3711_s1 + $0xa0] sm:$0xf] %vm632_vm2, %v636_v21  ;;  %105 = vst.msk [vmem:[%s3711_s1 + $0xa4] sm:$0xf] %vm632_vm2, %v636_v21 }
  0x3b   :  { %106 = vst.msk [vmem:[%s3711_s1 + $0xa8] sm:$0xf] %vm632_vm2, %v636_v21  ;;  %107 = vst.msk [vmem:[%s3711_s1 + $0xac] sm:$0xf] %vm632_vm2, %v636_v21 }
  0x3c   :  { %108 = vst.msk [vmem:[%s3711_s1 + $0xb0] sm:$0xf] %vm632_vm2, %v636_v21  ;;  %109 = vst.msk [vmem:[%s3711_s1 + $0xb4] sm:$0xf] %vm632_vm2, %v636_v21 }
  0x3d   :  { %110 = vst.msk [vmem:[%s3711_s1 + $0xb8] sm:$0xf] %vm632_vm2, %v636_v21  ;;  %111 = vst.msk [vmem:[%s3711_s1 + $0xbc] sm:$0xf] %vm632_vm2, %v636_v21 }
  0x3e   :  { %112 = vst.msk [vmem:[%s3711_s1 + $0xc0] sm:$0xf] %vm632_vm2, %v636_v21  ;;  %113 = vst.msk [vmem:[%s3711_s1 + $0xc4] sm:$0xf] %vm632_vm2, %v636_v21 }
  0x3f   :  { %114 = vst.msk [vmem:[%s3711_s1 + $0xc8] sm:$0xf] %vm632_vm2, %v636_v21  ;;  %115 = vst.msk [vmem:[%s3711_s1 + $0xcc] sm:$0xf] %vm632_vm2, %v636_v21 }
  0x40   :  { %116 = vst.msk [vmem:[%s3711_s1 + $0xd0] sm:$0xf] %vm632_vm2, %v636_v21  ;;  %117 = vst.msk [vmem:[%s3711_s1 + $0xd4] sm:$0xf] %vm632_vm2, %v636_v21 }
  0x41   :  { %118 = vst.msk [vmem:[%s3711_s1 + $0xd8] sm:$0xf] %vm632_vm2, %v636_v21  ;;  %119 = vst.msk [vmem:[%s3711_s1 + $0xdc] sm:$0xf] %vm632_vm2, %v636_v21 }
  0x42   :  { %120 = vst.msk [vmem:[%s3711_s1 + $0xe0] sm:$0xf] %vm632_vm2, %v636_v21  ;;  %121 = vst.msk [vmem:[%s3711_s1 + $0xe4] sm:$0xf] %vm632_vm2, %v636_v21 }
  0x43   :  { %122 = vst.msk [vmem:[%s3711_s1 + $0xe8] sm:$0xf] %vm632_vm2, %v636_v21  ;;  %123 = vst.msk [vmem:[%s3711_s1 + $0xec] sm:$0xf] %vm632_vm2, %v636_v21 }
  0x44   :  { %124 = vst.msk [vmem:[%s3711_s1 + $0xf0] sm:$0xf] %vm632_vm2, %v636_v21  ;;  %125 = vst.msk [vmem:[%s3711_s1 + $0xf4] sm:$0xf] %vm632_vm2, %v636_v21 }
  0x45   :  { %126 = vst.msk [vmem:[%s3711_s1 + $0xf8] sm:$0xf] %vm632_vm2, %v636_v21  ;;  %127 = vst.msk [vmem:[%s3711_s1 + $0xfc] sm:$0xf] %vm632_vm2, %v636_v21 }
  0x46   :  { %128 = vst.msk [vmem:[%s3711_s1 + $0x100] sm:$0xf] %vm632_vm2, %v636_v21  ;;  %129 = vst.msk [vmem:[%s3711_s1 + $0x104] sm:$0xf] %vm632_vm2, %v636_v21 }
  0x47   :  { %130 = vst.msk [vmem:[%s3711_s1 + $0x108] sm:$0xf] %vm632_vm2, %v636_v21  ;;  %131 = vst.msk [vmem:[%s3711_s1 + $0x10c] sm:$0xf] %vm632_vm2, %v636_v21 }
  0x48   :  { %132 = vst.msk [vmem:[%s3711_s1 + $0x110] sm:$0xf] %vm632_vm2, %v636_v21  ;;  %133 = vst.msk [vmem:[%s3711_s1 + $0x114] sm:$0xf] %vm632_vm2, %v636_v21 }
  0x49   :  { %134 = vst.msk [vmem:[%s3711_s1 + $0x118] sm:$0xf] %vm632_vm2, %v636_v21  ;;  %135 = vst.msk [vmem:[%s3711_s1 + $0x11c] sm:$0xf] %vm632_vm2, %v636_v21 }
  0x4a   :  { %136 = vst.msk [vmem:[%s3711_s1 + $0x120] sm:$0xf] %vm632_vm2, %v636_v21  ;;  %137 = vst.msk [vmem:[%s3711_s1 + $0x124] sm:$0xf] %vm632_vm2, %v636_v21 }
  0x4b   :  { %138 = vst.msk [vmem:[%s3711_s1 + $0x128] sm:$0xf] %vm632_vm2, %v636_v21  ;;  %139 = vst.msk [vmem:[%s3711_s1 + $0x12c] sm:$0xf] %vm632_vm2, %v636_v21 }
  0x4c   :  { %140 = vst.msk [vmem:[%s3711_s1 + $0x130] sm:$0xf] %vm632_vm2, %v636_v21  ;;  %141 = vst.msk [vmem:[%s3711_s1 + $0x134] sm:$0xf] %vm632_vm2, %v636_v21 }
  0x4d   :  { %142 = vst.msk [vmem:[%s3711_s1 + $0x138] sm:$0xf] %vm632_vm2, %v636_v21  ;;  %143 = vst.msk [vmem:[%s3711_s1 + $0x13c] sm:$0xf] %vm632_vm2, %v636_v21 }
  0x4e   :  { %144 = vst.msk [vmem:[%s3711_s1 + $0x140] sm:$0xf] %vm632_vm2, %v636_v21  ;;  %145 = vst.msk [vmem:[%s3711_s1 + $0x144] sm:$0xf] %vm632_vm2, %v636_v21 }
  0x4f   :  { %146 = vst.msk [vmem:[%s3711_s1 + $0x148] sm:$0xf] %vm632_vm2, %v636_v21  ;;  %147 = vst.msk [vmem:[%s3711_s1 + $0x14c] sm:$0xf] %vm632_vm2, %v636_v21 }
  0x50   :  { %148 = vst.msk [vmem:[%s3711_s1 + $0x150] sm:$0xf] %vm632_vm2, %v636_v21  ;;  %149 = vst.msk [vmem:[%s3711_s1 + $0x154] sm:$0xf] %vm632_vm2, %v636_v21 }
  0x51   :  { %150 = vst.msk [vmem:[%s3711_s1 + $0x158] sm:$0xf] %vm632_vm2, %v636_v21  ;;  %151 = vst.msk [vmem:[%s3711_s1 + $0x15c] sm:$0xf] %vm632_vm2, %v636_v21 }
  0x52   :  { %152 = vst.msk [vmem:[%s3711_s1 + $0x160] sm:$0xf] %vm632_vm2, %v636_v21  ;;  %153 = vst.msk [vmem:[%s3711_s1 + $0x164] sm:$0xf] %vm632_vm2, %v636_v21 }
  0x53   :  { %154 = vst.msk [vmem:[%s3711_s1 + $0x168] sm:$0xf] %vm632_vm2, %v636_v21  ;;  %155 = vst.msk [vmem:[%s3711_s1 + $0x16c] sm:$0xf] %vm632_vm2, %v636_v21 }
  0x54   :  { %156 = vst.msk [vmem:[%s3711_s1 + $0x170] sm:$0xf] %vm632_vm2, %v636_v21  ;;  %157 = vst.msk [vmem:[%s3711_s1 + $0x174] sm:$0xf] %vm632_vm2, %v636_v21 }
  0x55   :  { %158 = vst.msk [vmem:[%s3711_s1 + $0x178] sm:$0xf] %vm632_vm2, %v636_v21  ;;  %159 = vst.msk [vmem:[%s3711_s1 + $0x17c] sm:$0xf] %vm632_vm2, %v636_v21 }
  0x56   :  { %160 = vst.msk [vmem:[%s3711_s1 + $0x180] sm:$0xf] %vm632_vm2, %v636_v21  ;;  %161 = vst.msk [vmem:[%s3711_s1 + $0x184] sm:$0xf] %vm632_vm2, %v636_v21 }
  0x57   :  { %162 = vst.msk [vmem:[%s3711_s1 + $0x188] sm:$0xf] %vm632_vm2, %v636_v21  ;;  %163 = vst.msk [vmem:[%s3711_s1 + $0x18c] sm:$0xf] %vm632_vm2, %v636_v21 }
  0x58   :  { %164 = vst.msk [vmem:[%s3711_s1 + $0x190] sm:$0xf] %vm632_vm2, %v636_v21  ;;  %165 = vst.msk [vmem:[%s3711_s1 + $0x194] sm:$0xf] %vm632_vm2, %v636_v21 }
  0x59   :  { %166 = vst.msk [vmem:[%s3711_s1 + $0x198] sm:$0xf] %vm632_vm2, %v636_v21  ;;  %167 = vst.msk [vmem:[%s3711_s1 + $0x19c] sm:$0xf] %vm632_vm2, %v636_v21 }
  0x5a   :  { %168 = vst.msk [vmem:[%s3711_s1 + $0x1a0] sm:$0xf] %vm632_vm2, %v636_v21  ;;  %169 = vst.msk [vmem:[%s3711_s1 + $0x1a4] sm:$0xf] %vm632_vm2, %v636_v21 }
  0x5b   :  { %170 = vst.msk [vmem:[%s3711_s1 + $0x1a8] sm:$0xf] %vm632_vm2, %v636_v21  ;;  %171 = vst.msk [vmem:[%s3711_s1 + $0x1ac] sm:$0xf] %vm632_vm2, %v636_v21 }
  0x5c   :  { %172 = vst.msk [vmem:[%s3711_s1 + $0x1b0] sm:$0xf] %vm632_vm2, %v636_v21  ;;  %173 = vst.msk [vmem:[%s3711_s1 + $0x1b4] sm:$0xf] %vm632_vm2, %v636_v21 }
  0x5d   :  { %174 = vst.msk [vmem:[%s3711_s1 + $0x1b8] sm:$0xf] %vm632_vm2, %v636_v21  ;;  %175 = vst.msk [vmem:[%s3711_s1 + $0x1bc] sm:$0xf] %vm632_vm2, %v636_v21 }
  0x5e   :  { %176 = vst.msk [vmem:[%s3711_s1 + $0x1c0] sm:$0xf] %vm632_vm2, %v636_v21  ;;  %177 = vst.msk [vmem:[%s3711_s1 + $0x1c4] sm:$0xf] %vm632_vm2, %v636_v21 }
  0x5f   :  { %178 = vst.msk [vmem:[%s3711_s1 + $0x1c8] sm:$0xf] %vm632_vm2, %v636_v21  ;;  %179 = vst.msk [vmem:[%s3711_s1 + $0x1cc] sm:$0xf] %vm632_vm2, %v636_v21 }
  0x60   :  { %180 = vst.msk [vmem:[%s3711_s1 + $0x1d0] sm:$0xf] %vm632_vm2, %v636_v21  ;;  %181 = vst.msk [vmem:[%s3711_s1 + $0x1d4] sm:$0xf] %vm632_vm2, %v636_v21 }
  0x61   :  { %182 = vst.msk [vmem:[%s3711_s1 + $0x1d8] sm:$0xf] %vm632_vm2, %v636_v21  ;;  %183 = vst.msk [vmem:[%s3711_s1 + $0x1dc] sm:$0xf] %vm632_vm2, %v636_v21 }
  0x62   :  { %184 = vst.msk [vmem:[%s3711_s1 + $0x1e0] sm:$0xf] %vm632_vm2, %v636_v21  ;;  %185 = vst.msk [vmem:[%s3711_s1 + $0x1e4] sm:$0xf] %vm632_vm2, %v636_v21 }
  0x63   :  { %186 = vst.msk [vmem:[%s3711_s1 + $0x1e8] sm:$0xf] %vm632_vm2, %v636_v21  ;;  %187 = vst.msk [vmem:[%s3711_s1 + $0x1ec] sm:$0xf] %vm632_vm2, %v636_v21 }
  0x64   :  { %188 = vst.msk [vmem:[%s3711_s1 + $0x1f0] sm:$0xf] %vm632_vm2, %v636_v21  ;;  %189 = vst.msk [vmem:[%s3711_s1 + $0x1f4] sm:$0xf] %vm632_vm2, %v636_v21 }
  0x65   :  { %190 = vst.msk [vmem:[%s3711_s1 + $0x1f8] sm:$0xf] %vm632_vm2, %v636_v21  ;;  %191 = vst.msk [vmem:[%s3711_s1 + $0x1fc] sm:$0xf] %vm632_vm2, %v636_v21 }
  0x66   :  { %192 = vst.msk [vmem:[%s3711_s1 + $0x200] sm:$0xf] %vm632_vm2, %v636_v21  ;;  %193 = vst.msk [vmem:[%s3711_s1 + $0x204] sm:$0xf] %vm632_vm2, %v636_v21 }
  0x67   :  { %194 = vst.msk [vmem:[%s3711_s1 + $0x208] sm:$0xf] %vm632_vm2, %v636_v21  ;;  %195 = vst.msk [vmem:[%s3711_s1 + $0x20c] sm:$0xf] %vm632_vm2, %v636_v21 }
  0x68   :  { %196 = vst.msk [vmem:[%s3711_s1 + $0x210] sm:$0xf] %vm632_vm2, %v636_v21  ;;  %197 = vst.msk [vmem:[%s3711_s1 + $0x214] sm:$0xf] %vm632_vm2, %v636_v21 }
  0x69   :  { %198 = vst.msk [vmem:[%s3711_s1 + $0x218] sm:$0xf] %vm632_vm2, %v636_v21  ;;  %199 = vst.msk [vmem:[%s3711_s1 + $0x21c] sm:$0xf] %vm632_vm2, %v636_v21 }
  0x6a   :  { %200 = vst.msk [vmem:[%s3711_s1 + $0x220] sm:$0xf] %vm632_vm2, %v636_v21  ;;  %201 = vst.msk [vmem:[%s3711_s1 + $0x224] sm:$0xf] %vm632_vm2, %v636_v21 }
  0x6b   :  { %202 = vst.msk [vmem:[%s3711_s1 + $0x228] sm:$0xf] %vm632_vm2, %v636_v21  ;;  %203 = vst.msk [vmem:[%s3711_s1 + $0x22c] sm:$0xf] %vm632_vm2, %v636_v21 }
  0x6c   :  { %204 = vst.msk [vmem:[%s3711_s1 + $0x230] sm:$0xf] %vm632_vm2, %v636_v21  ;;  %205 = vst.msk [vmem:[%s3711_s1 + $0x234] sm:$0xf] %vm632_vm2, %v636_v21 }
  0x6d   :  { %206 = vst.msk [vmem:[%s3711_s1 + $0x238] sm:$0xf] %vm632_vm2, %v636_v21  ;;  %207 = vst.msk [vmem:[%s3711_s1 + $0x23c] sm:$0xf] %vm632_vm2, %v636_v21 }
  0x6e   :  { %208 = vst.msk [vmem:[%s3711_s1 + $0x240] sm:$0xf] %vm632_vm2, %v636_v21  ;;  %209 = vst.msk [vmem:[%s3711_s1 + $0x244] sm:$0xf] %vm632_vm2, %v636_v21 }
  0x6f   :  { %210 = vst.msk [vmem:[%s3711_s1 + $0x248] sm:$0xf] %vm632_vm2, %v636_v21  ;;  %211 = vst.msk [vmem:[%s3711_s1 + $0x24c] sm:$0xf] %vm632_vm2, %v636_v21 }
  0x70   :  { %212 = vst.msk [vmem:[%s3711_s1 + $0x250] sm:$0xf] %vm632_vm2, %v636_v21  ;;  %213 = vst.msk [vmem:[%s3711_s1 + $0x254] sm:$0xf] %vm632_vm2, %v636_v21 }
  0x71   :  { %214 = vst.msk [vmem:[%s3711_s1 + $0x258] sm:$0xf] %vm632_vm2, %v636_v21  ;;  %215 = vst.msk [vmem:[%s3711_s1 + $0x25c] sm:$0xf] %vm632_vm2, %v636_v21 }
  0x72   :  { %216 = vst.msk [vmem:[%s3711_s1 + $0x260] sm:$0xf] %vm632_vm2, %v636_v21  ;;  %217 = vst.msk [vmem:[%s3711_s1 + $0x264] sm:$0xf] %vm632_vm2, %v636_v21 }
  0x73   :  { %218 = vst.msk [vmem:[%s3711_s1 + $0x268] sm:$0xf] %vm632_vm2, %v636_v21  ;;  %219 = vst.msk [vmem:[%s3711_s1 + $0x26c] sm:$0xf] %vm632_vm2, %v636_v21 }
  0x74   :  { %220 = vst.msk [vmem:[%s3711_s1 + $0x270] sm:$0xf] %vm632_vm2, %v636_v21  ;;  %221 = vst.msk [vmem:[%s3711_s1 + $0x274] sm:$0xf] %vm632_vm2, %v636_v21 }
  0x75   :  { %222 = vst.msk [vmem:[%s3711_s1 + $0x278] sm:$0xf] %vm632_vm2, %v636_v21  ;;  %223 = vst.msk [vmem:[%s3711_s1 + $0x27c] sm:$0xf] %vm632_vm2, %v636_v21 }
  0x76   :  { %224 = vst.msk [vmem:[%s3711_s1 + $0x280] sm:$0xf] %vm632_vm2, %v636_v21  ;;  %225 = vst.msk [vmem:[%s3711_s1 + $0x284] sm:$0xf] %vm632_vm2, %v636_v21 }
  0x77   :  { %226 = vst.msk [vmem:[%s3711_s1 + $0x288] sm:$0xf] %vm632_vm2, %v636_v21  ;;  %227 = vst.msk [vmem:[%s3711_s1 + $0x28c] sm:$0xf] %vm632_vm2, %v636_v21 }
  0x78   :  { %228 = vst.msk [vmem:[%s3711_s1 + $0x290] sm:$0xf] %vm632_vm2, %v636_v21  ;;  %229 = vst.msk [vmem:[%s3711_s1 + $0x294] sm:$0xf] %vm632_vm2, %v636_v21 }
  0x79   :  { %230 = vst.msk [vmem:[%s3711_s1 + $0x298] sm:$0xf] %vm632_vm2, %v636_v21  ;;  %231 = vst.msk [vmem:[%s3711_s1 + $0x29c] sm:$0xf] %vm632_vm2, %v636_v21 }
  0x7a   :  { %232 = vst.msk [vmem:[%s3711_s1 + $0x2a0] sm:$0xf] %vm632_vm2, %v636_v21  ;;  %233 = vst.msk [vmem:[%s3711_s1 + $0x2a4] sm:$0xf] %vm632_vm2, %v636_v21 }
  0x7b   :  { %234 = vst.msk [vmem:[%s3711_s1 + $0x2a8] sm:$0xf] %vm632_vm2, %v636_v21  ;;  %235 = vst.msk [vmem:[%s3711_s1 + $0x2ac] sm:$0xf] %vm632_vm2, %v636_v21 }
  0x7c   :  { %236 = vst.msk [vmem:[%s3711_s1 + $0x2b0] sm:$0xf] %vm632_vm2, %v636_v21  ;;  %237 = vst.msk [vmem:[%s3711_s1 + $0x2b4] sm:$0xf] %vm632_vm2, %v636_v21 }
  0x7d   :  { %238 = vst.msk [vmem:[%s3711_s1 + $0x2b8] sm:$0xf] %vm632_vm2, %v636_v21  ;;  %239 = vst.msk [vmem:[%s3711_s1 + $0x2bc] sm:$0xf] %vm632_vm2, %v636_v21 }
  0x7e   :  { %240 = vst.msk [vmem:[%s3711_s1 + $0x2c0] sm:$0xf] %vm632_vm2, %v636_v21  ;;  %241 = vst.msk [vmem:[%s3711_s1 + $0x2c4] sm:$0xf] %vm632_vm2, %v636_v21 }
  0x7f   :  { %242 = vst.msk [vmem:[%s3711_s1 + $0x2c8] sm:$0xf] %vm632_vm2, %v636_v21  ;;  %243 = vst.msk [vmem:[%s3711_s1 + $0x2cc] sm:$0xf] %vm632_vm2, %v636_v21 }
  0x80   :  { %244 = vst.msk [vmem:[%s3711_s1 + $0x2d0] sm:$0xf] %vm632_vm2, %v636_v21  ;;  %245 = vst.msk [vmem:[%s3711_s1 + $0x2d4] sm:$0xf] %vm632_vm2, %v636_v21 }
  0x81   :  { %246 = vst.msk [vmem:[%s3711_s1 + $0x2d8] sm:$0xf] %vm632_vm2, %v636_v21  ;;  %247 = vst.msk [vmem:[%s3711_s1 + $0x2dc] sm:$0xf] %vm632_vm2, %v636_v21 }
  0x82   :  { %248 = vst.msk [vmem:[%s3711_s1 + $0x2e0] sm:$0xf] %vm632_vm2, %v636_v21  ;;  %249 = vst.msk [vmem:[%s3711_s1 + $0x2e4] sm:$0xf] %vm632_vm2, %v636_v21 }
  0x83   :  { %250 = vst.msk [vmem:[%s3711_s1 + $0x2e8] sm:$0xf] %vm632_vm2, %v636_v21  ;;  %251 = vst.msk [vmem:[%s3711_s1 + $0x2ec] sm:$0xf] %vm632_vm2, %v636_v21 }
  0x84   :  { %252 = vst.msk [vmem:[%s3711_s1 + $0x2f0] sm:$0xf] %vm632_vm2, %v636_v21  ;;  %253 = vst.msk [vmem:[%s3711_s1 + $0x2f4] sm:$0xf] %vm632_vm2, %v636_v21 }
  0x85   :  { %254 = vst.msk [vmem:[%s3711_s1 + $0x2f8] sm:$0xf] %vm632_vm2, %v636_v21  ;;  %255 = vst.msk [vmem:[%s3711_s1 + $0x2fc] sm:$0xf] %vm632_vm2, %v636_v21 }
  0x86   :  { %256 = vst.msk [vmem:[%s3711_s1 + $0x300] sm:$0xf] %vm632_vm2, %v636_v21  ;;  %257 = vst.msk [vmem:[%s3711_s1 + $0x304] sm:$0xf] %vm632_vm2, %v636_v21 }
  0x87   :  { %258 = vst.msk [vmem:[%s3711_s1 + $0x308] sm:$0xf] %vm632_vm2, %v636_v21  ;;  %259 = vst.msk [vmem:[%s3711_s1 + $0x30c] sm:$0xf] %vm632_vm2, %v636_v21 }
  0x88   :  { %260 = vst.msk [vmem:[%s3711_s1 + $0x310] sm:$0xf] %vm632_vm2, %v636_v21  ;;  %261 = vst.msk [vmem:[%s3711_s1 + $0x314] sm:$0xf] %vm632_vm2, %v636_v21 }
  0x89   :  { %262 = vst.msk [vmem:[%s3711_s1 + $0x318] sm:$0xf] %vm632_vm2, %v636_v21  ;;  %263 = vst.msk [vmem:[%s3711_s1 + $0x31c] sm:$0xf] %vm632_vm2, %v636_v21 }
  0x8a   :  { %264 = vst.msk [vmem:[%s3711_s1 + $0x320] sm:$0xf] %vm632_vm2, %v636_v21  ;;  %265 = vst.msk [vmem:[%s3711_s1 + $0x324] sm:$0xf] %vm632_vm2, %v636_v21 }
  0x8b   :  { %266 = vst.msk [vmem:[%s3711_s1 + $0x328] sm:$0xf] %vm632_vm2, %v636_v21  ;;  %267 = vst.msk [vmem:[%s3711_s1 + $0x32c] sm:$0xf] %vm632_vm2, %v636_v21 }
  0x8c   :  { %268 = vst.msk [vmem:[%s3711_s1 + $0x330] sm:$0xf] %vm632_vm2, %v636_v21  ;;  %269 = vst.msk [vmem:[%s3711_s1 + $0x334] sm:$0xf] %vm632_vm2, %v636_v21 }
  0x8d   :  { %270 = vst.msk [vmem:[%s3711_s1 + $0x338] sm:$0xf] %vm632_vm2, %v636_v21  ;;  %271 = vst.msk [vmem:[%s3711_s1 + $0x33c] sm:$0xf] %vm632_vm2, %v636_v21 }
  0x8e   :  { %272 = vst.msk [vmem:[%s3711_s1 + $0x340] sm:$0xf] %vm632_vm2, %v636_v21  ;;  %273 = vst.msk [vmem:[%s3711_s1 + $0x344] sm:$0xf] %vm632_vm2, %v636_v21 }
  0x8f   :  { %274 = vst.msk [vmem:[%s3711_s1 + $0x348] sm:$0xf] %vm632_vm2, %v636_v21  ;;  %275 = vst.msk [vmem:[%s3711_s1 + $0x34c] sm:$0xf] %vm632_vm2, %v636_v21 }
  0x90   :  { %276 = vst.msk [vmem:[%s3711_s1 + $0x350] sm:$0xf] %vm632_vm2, %v636_v21  ;;  %277 = vst.msk [vmem:[%s3711_s1 + $0x354] sm:$0xf] %vm632_vm2, %v636_v21 }
  0x91   :  { %278 = vst.msk [vmem:[%s3711_s1 + $0x358] sm:$0xf] %vm632_vm2, %v636_v21  ;;  %279 = vst.msk [vmem:[%s3711_s1 + $0x35c] sm:$0xf] %vm632_vm2, %v636_v21 }
  0x92   :  { %280 = vst.msk [vmem:[%s3711_s1 + $0x360] sm:$0xf] %vm632_vm2, %v636_v21  ;;  %281 = vst.msk [vmem:[%s3711_s1 + $0x364] sm:$0xf] %vm632_vm2, %v636_v21 }
  0x93   :  { %282 = vst.msk [vmem:[%s3711_s1 + $0x368] sm:$0xf] %vm632_vm2, %v636_v21  ;;  %283 = vst.msk [vmem:[%s3711_s1 + $0x36c] sm:$0xf] %vm632_vm2, %v636_v21 }
  0x94   :  { %284 = vst.msk [vmem:[%s3711_s1 + $0x370] sm:$0xf] %vm632_vm2, %v636_v21  ;;  %285 = vst.msk [vmem:[%s3711_s1 + $0x374] sm:$0xf] %vm632_vm2, %v636_v21 }
  0x95   :  { %286 = vst.msk [vmem:[%s3711_s1 + $0x378] sm:$0xf] %vm632_vm2, %v636_v21  ;;  %287 = vst.msk [vmem:[%s3711_s1 + $0x37c] sm:$0xf] %vm632_vm2, %v636_v21 }
  0x96   :  { %288 = vst.msk [vmem:[%s3711_s1 + $0x380] sm:$0xf] %vm632_vm2, %v636_v21  ;;  %289 = vst.msk [vmem:[%s3711_s1 + $0x384] sm:$0xf] %vm632_vm2, %v636_v21 }
  0x97   :  { %290 = vst.msk [vmem:[%s3711_s1 + $0x388] sm:$0xf] %vm632_vm2, %v636_v21  ;;  %291 = vst.msk [vmem:[%s3711_s1 + $0x38c] sm:$0xf] %vm632_vm2, %v636_v21 }
  0x98   :  { %292 = vst.msk [vmem:[%s3711_s1 + $0x390] sm:$0xf] %vm632_vm2, %v636_v21  ;;  %293 = vst.msk [vmem:[%s3711_s1 + $0x394] sm:$0xf] %vm632_vm2, %v636_v21 }
  0x99   :  { %294 = vst.msk [vmem:[%s3711_s1 + $0x398] sm:$0xf] %vm632_vm2, %v636_v21  ;;  %295 = vst.msk [vmem:[%s3711_s1 + $0x39c] sm:$0xf] %vm632_vm2, %v636_v21 }
  0x9a   :  { %296 = vst.msk [vmem:[%s3711_s1 + $0x3a0] sm:$0xf] %vm632_vm2, %v636_v21  ;;  %297 = vst.msk [vmem:[%s3711_s1 + $0x3a4] sm:$0xf] %vm632_vm2, %v636_v21 }
  0x9b   :  { %298 = vst.msk [vmem:[%s3711_s1 + $0x3a8] sm:$0xf] %vm632_vm2, %v636_v21  ;;  %299 = vst.msk [vmem:[%s3711_s1 + $0x3ac] sm:$0xf] %vm632_vm2, %v636_v21 }
  0x9c   :  { %300 = vst.msk [vmem:[%s3711_s1 + $0x3b0] sm:$0xf] %vm632_vm2, %v636_v21  ;;  %301 = vst.msk [vmem:[%s3711_s1 + $0x3b4] sm:$0xf] %vm632_vm2, %v636_v21 }
  0x9d   :  { %302 = vst.msk [vmem:[%s3711_s1 + $0x3b8] sm:$0xf] %vm632_vm2, %v636_v21  ;;  %303 = vst.msk [vmem:[%s3711_s1 + $0x3bc] sm:$0xf] %vm632_vm2, %v636_v21 }
  0x9e   :  { %304 = vst.msk [vmem:[%s3711_s1 + $0x3c0] sm:$0xf] %vm632_vm2, %v636_v21  ;;  %305 = vst.msk [vmem:[%s3711_s1 + $0x3c4] sm:$0xf] %vm632_vm2, %v636_v21 }
  0x9f   :  { %306 = vst.msk [vmem:[%s3711_s1 + $0x3c8] sm:$0xf] %vm632_vm2, %v636_v21  ;;  %307 = vst.msk [vmem:[%s3711_s1 + $0x3cc] sm:$0xf] %vm632_vm2, %v636_v21 }
  0xa0   :  { %308 = vst.msk [vmem:[%s3711_s1 + $0x3d0] sm:$0xf] %vm632_vm2, %v636_v21  ;;  %309 = vst.msk [vmem:[%s3711_s1 + $0x3d4] sm:$0xf] %vm632_vm2, %v636_v21 }
  0xa1   :  { %310 = vst.msk [vmem:[%s3711_s1 + $0x3d8] sm:$0xf] %vm632_vm2, %v636_v21  ;;  %311 = vst.msk [vmem:[%s3711_s1 + $0x3dc] sm:$0xf] %vm632_vm2, %v636_v21 }
  0xa2   :  { %312 = vst.msk [vmem:[%s3711_s1 + $0x3e0] sm:$0xf] %vm632_vm2, %v636_v21  ;;  %313 = vst.msk [vmem:[%s3711_s1 + $0x3e4] sm:$0xf] %vm632_vm2, %v636_v21 }
  0xa3   :  { %314 = vst.msk [vmem:[%s3711_s1 + $0x3e8] sm:$0xf] %vm632_vm2, %v636_v21  ;;  %315 = vst.msk [vmem:[%s3711_s1 + $0x3ec] sm:$0xf] %vm632_vm2, %v636_v21 }
  0xa4   :  { %316 = vst.msk [vmem:[%s3711_s1 + $0x3f0] sm:$0xf] %vm632_vm2, %v636_v21  ;;  %317 = vst.msk [vmem:[%s3711_s1 + $0x3f4] sm:$0xf] %vm632_vm2, %v636_v21 }
  0xa5   :  { %318 = vst.msk [vmem:[%s3711_s1 + $0x3f8] sm:$0xf] %vm632_vm2, %v636_v21  ;;  %319 = vst.msk [vmem:[%s3711_s1 + $0x3fc] sm:$0xf] %vm632_vm2, %v636_v21 }
  0xa6   :  { %320 = vst.msk [vmem:[%s3711_s1 + $0x400] sm:$0xf] %vm632_vm2, %v636_v21  ;;  %321 = vst.msk [vmem:[%s3711_s1 + $0x404] sm:$0xf] %vm632_vm2, %v636_v21 }
  0xa7   :  { %322 = vst.msk [vmem:[%s3711_s1 + $0x408] sm:$0xf] %vm632_vm2, %v636_v21  ;;  %323 = vst.msk [vmem:[%s3711_s1 + $0x40c] sm:$0xf] %vm632_vm2, %v636_v21 }
  0xa8   :  { %324 = vst.msk [vmem:[%s3711_s1 + $0x410] sm:$0xf] %vm632_vm2, %v636_v21  ;;  %325 = vst.msk [vmem:[%s3711_s1 + $0x414] sm:$0xf] %vm632_vm2, %v636_v21 }
  0xa9   :  { %326 = vst.msk [vmem:[%s3711_s1 + $0x418] sm:$0xf] %vm632_vm2, %v636_v21  ;;  %327 = vst.msk [vmem:[%s3711_s1 + $0x41c] sm:$0xf] %vm632_vm2, %v636_v21 }
  0xaa   :  { %328 = vst.msk [vmem:[%s3711_s1 + $0x420] sm:$0xf] %vm632_vm2, %v636_v21  ;;  %329 = vst.msk [vmem:[%s3711_s1 + $0x424] sm:$0xf] %vm632_vm2, %v636_v21 }
  0xab   :  { %330 = vst.msk [vmem:[%s3711_s1 + $0x428] sm:$0xf] %vm632_vm2, %v636_v21  ;;  %331 = vst.msk [vmem:[%s3711_s1 + $0x42c] sm:$0xf] %vm632_vm2, %v636_v21 }
  0xac   :  { %332 = vst.msk [vmem:[%s3711_s1 + $0x430] sm:$0xf] %vm632_vm2, %v636_v21  ;;  %333 = vst.msk [vmem:[%s3711_s1 + $0x434] sm:$0xf] %vm632_vm2, %v636_v21 }
  0xad   :  { %334 = vst.msk [vmem:[%s3711_s1 + $0x438] sm:$0xf] %vm632_vm2, %v636_v21  ;;  %335 = vst.msk [vmem:[%s3711_s1 + $0x43c] sm:$0xf] %vm632_vm2, %v636_v21 }
  0xae   :  { %336 = vst.msk [vmem:[%s3711_s1 + $0x440] sm:$0xf] %vm632_vm2, %v636_v21  ;;  %337 = vst.msk [vmem:[%s3711_s1 + $0x444] sm:$0xf] %vm632_vm2, %v636_v21 }
  0xaf   :  { %338 = vst.msk [vmem:[%s3711_s1 + $0x448] sm:$0xf] %vm632_vm2, %v636_v21  ;;  %339 = vst.msk [vmem:[%s3711_s1 + $0x44c] sm:$0xf] %vm632_vm2, %v636_v21 }
  0xb0   :  { %340 = vst.msk [vmem:[%s3711_s1 + $0x450] sm:$0xf] %vm632_vm2, %v636_v21  ;;  %341 = vst.msk [vmem:[%s3711_s1 + $0x454] sm:$0xf] %vm632_vm2, %v636_v21 }
  0xb1   :  { %342 = vst.msk [vmem:[%s3711_s1 + $0x458] sm:$0xf] %vm632_vm2, %v636_v21  ;;  %343 = vst.msk [vmem:[%s3711_s1 + $0x45c] sm:$0xf] %vm632_vm2, %v636_v21 }
  0xb2   :  { %344 = vst.msk [vmem:[%s3711_s1 + $0x460] sm:$0xf] %vm632_vm2, %v636_v21  ;;  %345 = vst.msk [vmem:[%s3711_s1 + $0x464] sm:$0xf] %vm632_vm2, %v636_v21 }
  0xb3   :  { %346 = vst.msk [vmem:[%s3711_s1 + $0x468] sm:$0xf] %vm632_vm2, %v636_v21  ;;  %347 = vst.msk [vmem:[%s3711_s1 + $0x46c] sm:$0xf] %vm632_vm2, %v636_v21 }
  0xb4   :  { %348 = vst.msk [vmem:[%s3711_s1 + $0x470] sm:$0xf] %vm632_vm2, %v636_v21  ;;  %349 = vst.msk [vmem:[%s3711_s1 + $0x474] sm:$0xf] %vm632_vm2, %v636_v21 }
  0xb5   :  { %350 = vst.msk [vmem:[%s3711_s1 + $0x478] sm:$0xf] %vm632_vm2, %v636_v21  ;;  %351 = vst.msk [vmem:[%s3711_s1 + $0x47c] sm:$0xf] %vm632_vm2, %v636_v21 }
  0xb6   :  { %352 = vst.msk [vmem:[%s3711_s1 + $0x480] sm:$0xf] %vm632_vm2, %v636_v21  ;;  %353 = vst.msk [vmem:[%s3711_s1 + $0x484] sm:$0xf] %vm632_vm2, %v636_v21 }
  0xb7   :  { %354 = vst.msk [vmem:[%s3711_s1 + $0x488] sm:$0xf] %vm632_vm2, %v636_v21  ;;  %355 = vst.msk [vmem:[%s3711_s1 + $0x48c] sm:$0xf] %vm632_vm2, %v636_v21 }
  0xb8   :  { %356 = vst.msk [vmem:[%s3711_s1 + $0x490] sm:$0xf] %vm632_vm2, %v636_v21  ;;  %357 = vst.msk [vmem:[%s3711_s1 + $0x494] sm:$0xf] %vm632_vm2, %v636_v21 }
  0xb9   :  { %358 = vst.msk [vmem:[%s3711_s1 + $0x498] sm:$0xf] %vm632_vm2, %v636_v21  ;;  %359 = vst.msk [vmem:[%s3711_s1 + $0x49c] sm:$0xf] %vm632_vm2, %v636_v21 }
  0xba   :  { %360 = vst.msk [vmem:[%s3711_s1 + $0x4a0] sm:$0xf] %vm632_vm2, %v636_v21  ;;  %361 = vst.msk [vmem:[%s3711_s1 + $0x4a4] sm:$0xf] %vm632_vm2, %v636_v21 }
  0xbb   :  { %362 = vst.msk [vmem:[%s3711_s1 + $0x4a8] sm:$0xf] %vm632_vm2, %v636_v21  ;;  %363 = vst.msk [vmem:[%s3711_s1 + $0x4ac] sm:$0xf] %vm632_vm2, %v636_v21 }
  0xbc   :  { %364 = vst.msk [vmem:[%s3711_s1 + $0x4b0] sm:$0xf] %vm632_vm2, %v636_v21  ;;  %365 = vst.msk [vmem:[%s3711_s1 + $0x4b4] sm:$0xf] %vm632_vm2, %v636_v21 }
  0xbd   :  { %366 = vst.msk [vmem:[%s3711_s1 + $0x4b8] sm:$0xf] %vm632_vm2, %v636_v21  ;;  %367 = vst.msk [vmem:[%s3711_s1 + $0x4bc] sm:$0xf] %vm632_vm2, %v636_v21 }
  0xbe   :  { %368 = vst.msk [vmem:[%s3711_s1 + $0x4c0] sm:$0xf] %vm632_vm2, %v636_v21  ;;  %369 = vst.msk [vmem:[%s3711_s1 + $0x4c4] sm:$0xf] %vm632_vm2, %v636_v21 }
  0xbf   :  { %370 = vst.msk [vmem:[%s3711_s1 + $0x4c8] sm:$0xf] %vm632_vm2, %v636_v21  ;;  %371 = vst.msk [vmem:[%s3711_s1 + $0x4cc] sm:$0xf] %vm632_vm2, %v636_v21 }
  0xc0   :  { %372 = vst.msk [vmem:[%s3711_s1 + $0x4d0] sm:$0xf] %vm632_vm2, %v636_v21  ;;  %373 = vst.msk [vmem:[%s3711_s1 + $0x4d4] sm:$0xf] %vm632_vm2, %v636_v21 }
  0xc1   :  { %374 = vst.msk [vmem:[%s3711_s1 + $0x4d8] sm:$0xf] %vm632_vm2, %v636_v21  ;;  %375 = vst.msk [vmem:[%s3711_s1 + $0x4dc] sm:$0xf] %vm632_vm2, %v636_v21 }
  0xc2   :  { %376 = vst.msk [vmem:[%s3711_s1 + $0x4e0] sm:$0xf] %vm632_vm2, %v636_v21  ;;  %377 = vst.msk [vmem:[%s3711_s1 + $0x4e4] sm:$0xf] %vm632_vm2, %v636_v21 }
  0xc3   :  { %378 = vst.msk [vmem:[%s3711_s1 + $0x4e8] sm:$0xf] %vm632_vm2, %v636_v21  ;;  %379 = vst.msk [vmem:[%s3711_s1 + $0x4ec] sm:$0xf] %vm632_vm2, %v636_v21 }
  0xc4   :  { %380 = vst.msk [vmem:[%s3711_s1 + $0x4f0] sm:$0xf] %vm632_vm2, %v636_v21  ;;  %381 = vst.msk [vmem:[%s3711_s1 + $0x4f4] sm:$0xf] %vm632_vm2, %v636_v21 }
  0xc5   :  { %382 = vst.msk [vmem:[%s3711_s1 + $0x4f8] sm:$0xf] %vm632_vm2, %v636_v21  ;;  %383 = vst.msk [vmem:[%s3711_s1 + $0x4fc] sm:$0xf] %vm632_vm2, %v636_v21 }
  0xc6   :  { %384 = vst.msk [vmem:[%s3711_s1 + $0x500] sm:$0xf] %vm632_vm2, %v636_v21  ;;  %385 = vst.msk [vmem:[%s3711_s1 + $0x504] sm:$0xf] %vm632_vm2, %v636_v21 }
  0xc7   :  { %386 = vst.msk [vmem:[%s3711_s1 + $0x508] sm:$0xf] %vm632_vm2, %v636_v21  ;;  %387 = vst.msk [vmem:[%s3711_s1 + $0x50c] sm:$0xf] %vm632_vm2, %v636_v21 }
  0xc8   :  { %388 = vst.msk [vmem:[%s3711_s1 + $0x510] sm:$0xf] %vm632_vm2, %v636_v21  ;;  %389 = vst.msk [vmem:[%s3711_s1 + $0x514] sm:$0xf] %vm632_vm2, %v636_v21 }
  0xc9   :  { %390 = vst.msk [vmem:[%s3711_s1 + $0x518] sm:$0xf] %vm632_vm2, %v636_v21  ;;  %391 = vst.msk [vmem:[%s3711_s1 + $0x51c] sm:$0xf] %vm632_vm2, %v636_v21 }
  0xca   :  { %392 = vst.msk [vmem:[%s3711_s1 + $0x520] sm:$0xf] %vm632_vm2, %v636_v21  ;;  %393 = vst.msk [vmem:[%s3711_s1 + $0x524] sm:$0xf] %vm632_vm2, %v636_v21 }
  0xcb   :  { %394 = vst.msk [vmem:[%s3711_s1 + $0x528] sm:$0xf] %vm632_vm2, %v636_v21  ;;  %395 = vst.msk [vmem:[%s3711_s1 + $0x52c] sm:$0xf] %vm632_vm2, %v636_v21 }
  0xcc   :  { %396 = vst.msk [vmem:[%s3711_s1 + $0x530] sm:$0xf] %vm632_vm2, %v636_v21  ;;  %397 = vst.msk [vmem:[%s3711_s1 + $0x534] sm:$0xf] %vm632_vm2, %v636_v21 }
  0xcd   :  { %398 = vst.msk [vmem:[%s3711_s1 + $0x538] sm:$0xf] %vm632_vm2, %v636_v21  ;;  %399 = vst.msk [vmem:[%s3711_s1 + $0x53c] sm:$0xf] %vm632_vm2, %v636_v21 }
  0xce   :  { %400 = vst.msk [vmem:[%s3711_s1 + $0x540] sm:$0xf] %vm632_vm2, %v636_v21  ;;  %401 = vst.msk [vmem:[%s3711_s1 + $0x544] sm:$0xf] %vm632_vm2, %v636_v21 }
  0xcf   :  { %402 = vst.msk [vmem:[%s3711_s1 + $0x548] sm:$0xf] %vm632_vm2, %v636_v21  ;;  %403 = vst.msk [vmem:[%s3711_s1 + $0x54c] sm:$0xf] %vm632_vm2, %v636_v21 }
  0xd0   :  { %404 = vst.msk [vmem:[%s3711_s1 + $0x550] sm:$0xf] %vm632_vm2, %v636_v21  ;;  %405 = vst.msk [vmem:[%s3711_s1 + $0x554] sm:$0xf] %vm632_vm2, %v636_v21 }
  0xd1   :  { %406 = vst.msk [vmem:[%s3711_s1 + $0x558] sm:$0xf] %vm632_vm2, %v636_v21  ;;  %407 = vst.msk [vmem:[%s3711_s1 + $0x55c] sm:$0xf] %vm632_vm2, %v636_v21 }
  0xd2   :  { %408 = vst.msk [vmem:[%s3711_s1 + $0x560] sm:$0xf] %vm632_vm2, %v636_v21  ;;  %409 = vst.msk [vmem:[%s3711_s1 + $0x564] sm:$0xf] %vm632_vm2, %v636_v21 }
  0xd3   :  { %410 = vst.msk [vmem:[%s3711_s1 + $0x568] sm:$0xf] %vm632_vm2, %v636_v21  ;;  %411 = vst.msk [vmem:[%s3711_s1 + $0x56c] sm:$0xf] %vm632_vm2, %v636_v21 }
  0xd4   :  { %412 = vst.msk [vmem:[%s3711_s1 + $0x570] sm:$0xf] %vm632_vm2, %v636_v21  ;;  %413 = vst.msk [vmem:[%s3711_s1 + $0x574] sm:$0xf] %vm632_vm2, %v636_v21 }
  0xd5   :  { %414 = vst.msk [vmem:[%s3711_s1 + $0x578] sm:$0xf] %vm632_vm2, %v636_v21  ;;  %415 = vst.msk [vmem:[%s3711_s1 + $0x57c] sm:$0xf] %vm632_vm2, %v636_v21 }
  0xd6   :  { %416 = vst.msk [vmem:[%s3711_s1 + $0x580] sm:$0xf] %vm632_vm2, %v636_v21  ;;  %417 = vst.msk [vmem:[%s3711_s1 + $0x584] sm:$0xf] %vm632_vm2, %v636_v21 }
  0xd7   :  { %418 = vst.msk [vmem:[%s3711_s1 + $0x588] sm:$0xf] %vm632_vm2, %v636_v21  ;;  %419 = vst.msk [vmem:[%s3711_s1 + $0x58c] sm:$0xf] %vm632_vm2, %v636_v21 }
  0xd8   :  { %420 = vst.msk [vmem:[%s3711_s1 + $0x590] sm:$0xf] %vm632_vm2, %v636_v21  ;;  %421 = vst.msk [vmem:[%s3711_s1 + $0x594] sm:$0xf] %vm632_vm2, %v636_v21 }
  0xd9   :  { %422 = vst.msk [vmem:[%s3711_s1 + $0x598] sm:$0xf] %vm632_vm2, %v636_v21  ;;  %423 = vst.msk [vmem:[%s3711_s1 + $0x59c] sm:$0xf] %vm632_vm2, %v636_v21 }
  0xda   :  { %424 = vst.msk [vmem:[%s3711_s1 + $0x5a0] sm:$0xf] %vm632_vm2, %v636_v21  ;;  %425 = vst.msk [vmem:[%s3711_s1 + $0x5a4] sm:$0xf] %vm632_vm2, %v636_v21 }
  0xdb   :  { %426 = vst.msk [vmem:[%s3711_s1 + $0x5a8] sm:$0xf] %vm632_vm2, %v636_v21  ;;  %427 = vst.msk [vmem:[%s3711_s1 + $0x5ac] sm:$0xf] %vm632_vm2, %v636_v21 }
  0xdc   :  { %428 = vst.msk [vmem:[%s3711_s1 + $0x5b0] sm:$0xf] %vm632_vm2, %v636_v21  ;;  %429 = vst.msk [vmem:[%s3711_s1 + $0x5b4] sm:$0xf] %vm632_vm2, %v636_v21 }
  0xdd   :  { %430 = vst.msk [vmem:[%s3711_s1 + $0x5b8] sm:$0xf] %vm632_vm2, %v636_v21  ;;  %431 = vst.msk [vmem:[%s3711_s1 + $0x5bc] sm:$0xf] %vm632_vm2, %v636_v21 }
  0xde   :  { %432 = vst.msk [vmem:[%s3711_s1 + $0x5c0] sm:$0xf] %vm632_vm2, %v636_v21  ;;  %433 = vst.msk [vmem:[%s3711_s1 + $0x5c4] sm:$0xf] %vm632_vm2, %v636_v21 }
  0xdf   :  { %434 = vst.msk [vmem:[%s3711_s1 + $0x5c8] sm:$0xf] %vm632_vm2, %v636_v21  ;;  %435 = vst.msk [vmem:[%s3711_s1 + $0x5cc] sm:$0xf] %vm632_vm2, %v636_v21 }
  0xe0   :  { %436 = vst.msk [vmem:[%s3711_s1 + $0x5d0] sm:$0xf] %vm632_vm2, %v636_v21  ;;  %437 = vst.msk [vmem:[%s3711_s1 + $0x5d4] sm:$0xf] %vm632_vm2, %v636_v21 }
  0xe1   :  { %438 = vst.msk [vmem:[%s3711_s1 + $0x5d8] sm:$0xf] %vm632_vm2, %v636_v21  ;;  %439 = vst.msk [vmem:[%s3711_s1 + $0x5dc] sm:$0xf] %vm632_vm2, %v636_v21 }
  0xe2   :  { %440 = vst.msk [vmem:[%s3711_s1 + $0x5e0] sm:$0xf] %vm632_vm2, %v636_v21  ;;  %441 = vst.msk [vmem:[%s3711_s1 + $0x5e4] sm:$0xf] %vm632_vm2, %v636_v21 }
  0xe3   :  { %442 = vst.msk [vmem:[%s3711_s1 + $0x5e8] sm:$0xf] %vm632_vm2, %v636_v21  ;;  %443 = vst.msk [vmem:[%s3711_s1 + $0x5ec] sm:$0xf] %vm632_vm2, %v636_v21 }
  0xe4   :  { %444 = vst.msk [vmem:[%s3711_s1 + $0x5f0] sm:$0xf] %vm632_vm2, %v636_v21  ;;  %445 = vst.msk [vmem:[%s3711_s1 + $0x5f4] sm:$0xf] %vm632_vm2, %v636_v21 }
  0xe5   :  { %446 = vst.msk [vmem:[%s3711_s1 + $0x5f8] sm:$0xf] %vm632_vm2, %v636_v21  ;;  %447 = vst.msk [vmem:[%s3711_s1 + $0x5fc] sm:$0xf] %vm632_vm2, %v636_v21 }
  0xe6   :  { %448 = vst.msk [vmem:[%s3711_s1 + $0x600] sm:$0xf] %vm632_vm2, %v636_v21  ;;  %449 = vst.msk [vmem:[%s3711_s1 + $0x604] sm:$0xf] %vm632_vm2, %v636_v21 }
  0xe7   :  { %450 = vst.msk [vmem:[%s3711_s1 + $0x608] sm:$0xf] %vm632_vm2, %v636_v21  ;;  %451 = vst.msk [vmem:[%s3711_s1 + $0x60c] sm:$0xf] %vm632_vm2, %v636_v21 }
  0xe8   :  { %452 = vst.msk [vmem:[%s3711_s1 + $0x610] sm:$0xf] %vm632_vm2, %v636_v21  ;;  %453 = vst.msk [vmem:[%s3711_s1 + $0x614] sm:$0xf] %vm632_vm2, %v636_v21 }
  0xe9   :  { %454 = vst.msk [vmem:[%s3711_s1 + $0x618] sm:$0xf] %vm632_vm2, %v636_v21  ;;  %455 = vst.msk [vmem:[%s3711_s1 + $0x61c] sm:$0xf] %vm632_vm2, %v636_v21 }
  0xea   :  { %456 = vst.msk [vmem:[%s3711_s1 + $0x620] sm:$0xf] %vm632_vm2, %v636_v21  ;;  %457 = vst.msk [vmem:[%s3711_s1 + $0x624] sm:$0xf] %vm632_vm2, %v636_v21 }
  0xeb   :  { %458 = vst.msk [vmem:[%s3711_s1 + $0x628] sm:$0xf] %vm632_vm2, %v636_v21  ;;  %459 = vst.msk [vmem:[%s3711_s1 + $0x62c] sm:$0xf] %vm632_vm2, %v636_v21 }
  0xec   :  { %460 = vst.msk [vmem:[%s3711_s1 + $0x630] sm:$0xf] %vm632_vm2, %v636_v21  ;;  %461 = vst.msk [vmem:[%s3711_s1 + $0x634] sm:$0xf] %vm632_vm2, %v636_v21 }
  0xed   :  { %462 = vst.msk [vmem:[%s3711_s1 + $0x638] sm:$0xf] %vm632_vm2, %v636_v21  ;;  %463 = vst.msk [vmem:[%s3711_s1 + $0x63c] sm:$0xf] %vm632_vm2, %v636_v21 }
  0xee   :  { %464 = vst.msk [vmem:[%s3711_s1 + $0x640] sm:$0xf] %vm632_vm2, %v636_v21  ;;  %465 = vst.msk [vmem:[%s3711_s1 + $0x644] sm:$0xf] %vm632_vm2, %v636_v21 }
  0xef   :  { %466 = vst.msk [vmem:[%s3711_s1 + $0x648] sm:$0xf] %vm632_vm2, %v636_v21  ;;  %467 = vst.msk [vmem:[%s3711_s1 + $0x64c] sm:$0xf] %vm632_vm2, %v636_v21 }
  0xf0   :  { %468 = vst.msk [vmem:[%s3711_s1 + $0x650] sm:$0xf] %vm632_vm2, %v636_v21  ;;  %469 = vst.msk [vmem:[%s3711_s1 + $0x654] sm:$0xf] %vm632_vm2, %v636_v21 }
  0xf1   :  { %470 = vst.msk [vmem:[%s3711_s1 + $0x658] sm:$0xf] %vm632_vm2, %v636_v21  ;;  %471 = vst.msk [vmem:[%s3711_s1 + $0x65c] sm:$0xf] %vm632_vm2, %v636_v21 }
  0xf2   :  { %472 = vst.msk [vmem:[%s3711_s1 + $0x660] sm:$0xf] %vm632_vm2, %v636_v21  ;;  %473 = vst.msk [vmem:[%s3711_s1 + $0x664] sm:$0xf] %vm632_vm2, %v636_v21 }
  0xf3   :  { %474 = vst.msk [vmem:[%s3711_s1 + $0x668] sm:$0xf] %vm632_vm2, %v636_v21  ;;  %475 = vst.msk [vmem:[%s3711_s1 + $0x66c] sm:$0xf] %vm632_vm2, %v636_v21 }
  0xf4   :  { %476 = vst.msk [vmem:[%s3711_s1 + $0x670] sm:$0xf] %vm632_vm2, %v636_v21  ;;  %477 = vst.msk [vmem:[%s3711_s1 + $0x674] sm:$0xf] %vm632_vm2, %v636_v21 }
  0xf5   :  { %478 = vst.msk [vmem:[%s3711_s1 + $0x678] sm:$0xf] %vm632_vm2, %v636_v21  ;;  %479 = vst.msk [vmem:[%s3711_s1 + $0x67c] sm:$0xf] %vm632_vm2, %v636_v21 }
  0xf6   :  { %480 = vst.msk [vmem:[%s3711_s1 + $0x680] sm:$0xf] %vm632_vm2, %v636_v21  ;;  %481 = vst.msk [vmem:[%s3711_s1 + $0x684] sm:$0xf] %vm632_vm2, %v636_v21 }
  0xf7   :  { %482 = vst.msk [vmem:[%s3711_s1 + $0x688] sm:$0xf] %vm632_vm2, %v636_v21  ;;  %483 = vst.msk [vmem:[%s3711_s1 + $0x68c] sm:$0xf] %vm632_vm2, %v636_v21 }
  0xf8   :  { %484 = vst.msk [vmem:[%s3711_s1 + $0x690] sm:$0xf] %vm632_vm2, %v636_v21  ;;  %485 = vst.msk [vmem:[%s3711_s1 + $0x694] sm:$0xf] %vm632_vm2, %v636_v21 }
  0xf9   :  { %486 = vst.msk [vmem:[%s3711_s1 + $0x698] sm:$0xf] %vm632_vm2, %v636_v21  ;;  %487 = vst.msk [vmem:[%s3711_s1 + $0x69c] sm:$0xf] %vm632_vm2, %v636_v21 }
  0xfa   :  { %488 = vst.msk [vmem:[%s3711_s1 + $0x6a0] sm:$0xf] %vm632_vm2, %v636_v21  ;;  %489 = vst.msk [vmem:[%s3711_s1 + $0x6a4] sm:$0xf] %vm632_vm2, %v636_v21 }
  0xfb   :  { %490 = vst.msk [vmem:[%s3711_s1 + $0x6a8] sm:$0xf] %vm632_vm2, %v636_v21  ;;  %491 = vst.msk [vmem:[%s3711_s1 + $0x6ac] sm:$0xf] %vm632_vm2, %v636_v21 }
  0xfc   :  { %492 = vst.msk [vmem:[%s3711_s1 + $0x6b0] sm:$0xf] %vm632_vm2, %v636_v21  ;;  %493 = vst.msk [vmem:[%s3711_s1 + $0x6b4] sm:$0xf] %vm632_vm2, %v636_v21 }
  0xfd   :  { %494 = vst.msk [vmem:[%s3711_s1 + $0x6b8] sm:$0xf] %vm632_vm2, %v636_v21  ;;  %495 = vst.msk [vmem:[%s3711_s1 + $0x6bc] sm:$0xf] %vm632_vm2, %v636_v21 }
  0xfe   :  { %496 = vst.msk [vmem:[%s3711_s1 + $0x6c0] sm:$0xf] %vm632_vm2, %v636_v21  ;;  %497 = vst.msk [vmem:[%s3711_s1 + $0x6c4] sm:$0xf] %vm632_vm2, %v636_v21 }
  0xff   :  { %498 = vst.msk [vmem:[%s3711_s1 + $0x6c8] sm:$0xf] %vm632_vm2, %v636_v21  ;;  %499 = vst.msk [vmem:[%s3711_s1 + $0x6cc] sm:$0xf] %vm632_vm2, %v636_v21 }
 0x100   :  { %500 = vst.msk [vmem:[%s3711_s1 + $0x6d0] sm:$0xf] %vm632_vm2, %v636_v21  ;;  %501 = vst.msk [vmem:[%s3711_s1 + $0x6d4] sm:$0xf] %vm632_vm2, %v636_v21 }
 0x101   :  { %502 = vst.msk [vmem:[%s3711_s1 + $0x6d8] sm:$0xf] %vm632_vm2, %v636_v21  ;;  %503 = vst.msk [vmem:[%s3711_s1 + $0x6dc] sm:$0xf] %vm632_vm2, %v636_v21 }
 0x102   :  { %504 = vst.msk [vmem:[%s3711_s1 + $0x6e0] sm:$0xf] %vm632_vm2, %v636_v21  ;;  %505 = vst.msk [vmem:[%s3711_s1 + $0x6e4] sm:$0xf] %vm632_vm2, %v636_v21 }
 0x103   :  { %506 = vst.msk [vmem:[%s3711_s1 + $0x6e8] sm:$0xf] %vm632_vm2, %v636_v21  ;;  %507 = vst.msk [vmem:[%s3711_s1 + $0x6ec] sm:$0xf] %vm632_vm2, %v636_v21 }
 0x104   :  { %508 = vst.msk [vmem:[%s3711_s1 + $0x6f0] sm:$0xf] %vm632_vm2, %v636_v21  ;;  %509 = vst.msk [vmem:[%s3711_s1 + $0x6f4] sm:$0xf] %vm632_vm2, %v636_v21 }
 0x105   :  { %510 = vst.msk [vmem:[%s3711_s1 + $0x6f8] sm:$0xf] %vm632_vm2, %v636_v21  ;;  %511 = vst.msk [vmem:[%s3711_s1 + $0x6fc] sm:$0xf] %vm632_vm2, %v636_v21 }
 0x106   :  { %512 = vst.msk [vmem:[%s3711_s1 + $0x700] sm:$0xf] %vm632_vm2, %v636_v21  ;;  %513 = vst.msk [vmem:[%s3711_s1 + $0x704] sm:$0xf] %vm632_vm2, %v636_v21 }
 0x107   :  { %514 = vst.msk [vmem:[%s3711_s1 + $0x708] sm:$0xf] %vm632_vm2, %v636_v21  ;;  %515 = vst.msk [vmem:[%s3711_s1 + $0x70c] sm:$0xf] %vm632_vm2, %v636_v21 }
 0x108   :  { %516 = vst.msk [vmem:[%s3711_s1 + $0x710] sm:$0xf] %vm632_vm2, %v636_v21  ;;  %517 = vst.msk [vmem:[%s3711_s1 + $0x714] sm:$0xf] %vm632_vm2, %v636_v21 }
 0x109   :  { %518 = vst.msk [vmem:[%s3711_s1 + $0x718] sm:$0xf] %vm632_vm2, %v636_v21  ;;  %519 = vst.msk [vmem:[%s3711_s1 + $0x71c] sm:$0xf] %vm632_vm2, %v636_v21 }
 0x10a   :  { %520 = vst.msk [vmem:[%s3711_s1 + $0x720] sm:$0xf] %vm632_vm2, %v636_v21  ;;  %521 = vst.msk [vmem:[%s3711_s1 + $0x724] sm:$0xf] %vm632_vm2, %v636_v21 }
 0x10b   :  { %522 = vst.msk [vmem:[%s3711_s1 + $0x728] sm:$0xf] %vm632_vm2, %v636_v21  ;;  %523 = vst.msk [vmem:[%s3711_s1 + $0x72c] sm:$0xf] %vm632_vm2, %v636_v21 }
 0x10c   :  { %524 = vst.msk [vmem:[%s3711_s1 + $0x730] sm:$0xf] %vm632_vm2, %v636_v21  ;;  %525 = vst.msk [vmem:[%s3711_s1 + $0x734] sm:$0xf] %vm632_vm2, %v636_v21 }
 0x10d   :  { %526 = vst.msk [vmem:[%s3711_s1 + $0x738] sm:$0xf] %vm632_vm2, %v636_v21  ;;  %527 = vst.msk [vmem:[%s3711_s1 + $0x73c] sm:$0xf] %vm632_vm2, %v636_v21 }
 0x10e   :  { %528 = vst.msk [vmem:[%s3711_s1 + $0x740] sm:$0xf] %vm632_vm2, %v636_v21  ;;  %529 = vst.msk [vmem:[%s3711_s1 + $0x744] sm:$0xf] %vm632_vm2, %v636_v21 }
 0x10f   :  { %530 = vst.msk [vmem:[%s3711_s1 + $0x748] sm:$0xf] %vm632_vm2, %v636_v21  ;;  %531 = vst.msk [vmem:[%s3711_s1 + $0x74c] sm:$0xf] %vm632_vm2, %v636_v21 }
 0x110   :  { %532 = vst.msk [vmem:[%s3711_s1 + $0x750] sm:$0xf] %vm632_vm2, %v636_v21  ;;  %533 = vst.msk [vmem:[%s3711_s1 + $0x754] sm:$0xf] %vm632_vm2, %v636_v21 }
 0x111   :  { %534 = vst.msk [vmem:[%s3711_s1 + $0x758] sm:$0xf] %vm632_vm2, %v636_v21  ;;  %535 = vst.msk [vmem:[%s3711_s1 + $0x75c] sm:$0xf] %vm632_vm2, %v636_v21 }
 0x112   :  { %536 = vst.msk [vmem:[%s3711_s1 + $0x760] sm:$0xf] %vm632_vm2, %v636_v21  ;;  %537 = vst.msk [vmem:[%s3711_s1 + $0x764] sm:$0xf] %vm632_vm2, %v636_v21 }
 0x113   :  { %538 = vst.msk [vmem:[%s3711_s1 + $0x768] sm:$0xf] %vm632_vm2, %v636_v21  ;;  %539 = vst.msk [vmem:[%s3711_s1 + $0x76c] sm:$0xf] %vm632_vm2, %v636_v21 }
 0x114   :  { %540 = vst.msk [vmem:[%s3711_s1 + $0x770] sm:$0xf] %vm632_vm2, %v636_v21  ;;  %541 = vst.msk [vmem:[%s3711_s1 + $0x774] sm:$0xf] %vm632_vm2, %v636_v21 }
 0x115   :  { %542 = vst.msk [vmem:[%s3711_s1 + $0x778] sm:$0xf] %vm632_vm2, %v636_v21  ;;  %543 = vst.msk [vmem:[%s3711_s1 + $0x77c] sm:$0xf] %vm632_vm2, %v636_v21 }
 0x116   :  { %544 = vst.msk [vmem:[%s3711_s1 + $0x780] sm:$0xf] %vm632_vm2, %v636_v21  ;;  %545 = vst.msk [vmem:[%s3711_s1 + $0x784] sm:$0xf] %vm632_vm2, %v636_v21 }
 0x117   :  { %546 = vst.msk [vmem:[%s3711_s1 + $0x788] sm:$0xf] %vm632_vm2, %v636_v21  ;;  %547 = vst.msk [vmem:[%s3711_s1 + $0x78c] sm:$0xf] %vm632_vm2, %v636_v21 }
 0x118   :  { %548 = vst.msk [vmem:[%s3711_s1 + $0x790] sm:$0xf] %vm632_vm2, %v636_v21  ;;  %549 = vst.msk [vmem:[%s3711_s1 + $0x794] sm:$0xf] %vm632_vm2, %v636_v21 }
 0x119   :  { %550 = vst.msk [vmem:[%s3711_s1 + $0x798] sm:$0xf] %vm632_vm2, %v636_v21  ;;  %551 = vst.msk [vmem:[%s3711_s1 + $0x79c] sm:$0xf] %vm632_vm2, %v636_v21 }
 0x11a   :  { %552 = vst.msk [vmem:[%s3711_s1 + $0x7a0] sm:$0xf] %vm632_vm2, %v636_v21  ;;  %553 = vst.msk [vmem:[%s3711_s1 + $0x7a4] sm:$0xf] %vm632_vm2, %v636_v21 }
 0x11b   :  { %554 = vst.msk [vmem:[%s3711_s1 + $0x7a8] sm:$0xf] %vm632_vm2, %v636_v21  ;;  %555 = vst.msk [vmem:[%s3711_s1 + $0x7ac] sm:$0xf] %vm632_vm2, %v636_v21 }
 0x11c   :  { %556 = vst.msk [vmem:[%s3711_s1 + $0x7b0] sm:$0xf] %vm632_vm2, %v636_v21  ;;  %557 = vst.msk [vmem:[%s3711_s1 + $0x7b4] sm:$0xf] %vm632_vm2, %v636_v21 }
 0x11d   :  { %558 = vst.msk [vmem:[%s3711_s1 + $0x7b8] sm:$0xf] %vm632_vm2, %v636_v21  ;;  %559 = vst.msk [vmem:[%s3711_s1 + $0x7bc] sm:$0xf] %vm632_vm2, %v636_v21 }
 0x11e   :  { %560 = vst.msk [vmem:[%s3711_s1 + $0x7c0] sm:$0xf] %vm632_vm2, %v636_v21  ;;  %561 = vst.msk [vmem:[%s3711_s1 + $0x7c4] sm:$0xf] %vm632_vm2, %v636_v21 }
 0x11f   :  { %562 = vst.msk [vmem:[%s3711_s1 + $0x7c8] sm:$0xf] %vm632_vm2, %v636_v21  ;;  %563 = vst.msk [vmem:[%s3711_s1 + $0x7cc] sm:$0xf] %vm632_vm2, %v636_v21 }
 0x120   :  { %564 = vst.msk [vmem:[%s3711_s1 + $0x7d0] sm:$0xf] %vm632_vm2, %v636_v21  ;;  %565 = vst.msk [vmem:[%s3711_s1 + $0x7d4] sm:$0xf] %vm632_vm2, %v636_v21 }
 0x121   :  { %566 = vst.msk [vmem:[%s3711_s1 + $0x7d8] sm:$0xf] %vm632_vm2, %v636_v21  ;;  %567 = vst.msk [vmem:[%s3711_s1 + $0x7dc] sm:$0xf] %vm632_vm2, %v636_v21 }
 0x122   :  { %568 = vst.msk [vmem:[%s3711_s1 + $0x7e0] sm:$0xf] %vm632_vm2, %v636_v21  ;;  %569 = vst.msk [vmem:[%s3711_s1 + $0x7e4] sm:$0xf] %vm632_vm2, %v636_v21 }
 0x123   :  { %570 = vst.msk [vmem:[%s3711_s1 + $0x7e8] sm:$0xf] %vm632_vm2, %v636_v21  ;;  %571 = vst.msk [vmem:[%s3711_s1 + $0x7ec] sm:$0xf] %vm632_vm2, %v636_v21 }
 0x124   :  { %572 = vst.msk [vmem:[%s3711_s1 + $0x7f0] sm:$0xf] %vm632_vm2, %v636_v21  ;;  %573 = vst.msk [vmem:[%s3711_s1 + $0x7f4] sm:$0xf] %vm632_vm2, %v636_v21 }
 0x125   :  { %574 = vst.msk [vmem:[%s3711_s1 + $0x7f8] sm:$0xf] %vm632_vm2, %v636_v21  ;;  %575 = vst.msk [vmem:[%s3711_s1 + $0x7fc] sm:$0xf] %vm632_vm2, %v636_v21 }
 0x126   :  { %580 = vsyncpa [#allocation3], 1 }

</bundles_post_ra>
